<compile_context>
chip_gen: v7x
topology: tpu7x:2x2x1
jax: 0.10.0
libtpu: 0.0.40
codegen_flags: <defaults>
</compile_context>

<pallas_src>
import functools

import jax
import jax.numpy as jnp
from jax.experimental import pallas as pl
from jax.experimental.pallas import tpu as pltpu

HIDDEN = 128   # fc1/fc2 width (fixed by the module)
LANE = 128     # lane-dense padded classifier width


# ----------------------------------------------------------------------------
# Pallas kernel: fused fc1+ReLU -> fc2+ReLU -> fc3 for one batch tile
# ----------------------------------------------------------------------------
def mlp_kernel(x_ref, w1_ref, w2_ref, w3_ref, bias_ref, o_ref):
    """x: (B, F) bf16; w1: (F, 128) bf16; w2: (128, 128) bf16;
    w3: (128, 128) bf16 zero-padded; bias: (3, 128) f32 rows = [b1, b2, b3_pad];
    o: (B, 128) f32."""
    bias = bias_ref[...]  # (3, 128) f32

    # bf16 x bf16 -> f32 accumulate on the MXU; elementwise math in f32.
    h = jnp.dot(x_ref[...], w1_ref[...], preferred_element_type=jnp.float32)
    h = jnp.maximum(h + bias[0:1, :], 0.0)

    h = jnp.dot(h.astype(jnp.bfloat16), w2_ref[...],
                preferred_element_type=jnp.float32)
    h = jnp.maximum(h + bias[1:2, :], 0.0)

    o = jnp.dot(h.astype(jnp.bfloat16), w3_ref[...],
                preferred_element_type=jnp.float32)
    o_ref[...] = (o + bias[2:3, :]).astype(o_ref.dtype)


# ----------------------------------------------------------------------------
# Helpers
# ----------------------------------------------------------------------------
def _round_up(n, m):
    return (n + m - 1) // m * m


def _pick_block_b(n_rows, feat, vmem_budget_bytes=14 << 20, max_b=1024):
    """Largest batch tile (multiple of 8) whose double-buffered working set fits
    the VMEM budget.  14 MiB stays under v5e's 16 MiB default scoped limit and
    well under v6e/v7x limits, so no vmem_limit_bytes override is needed."""
    # Per-row bytes: double-buffered x tile (bf16) + double-buffered out (f32).
    per_row = 2 * feat * 2 + 2 * LANE * 4
    # Grid-invariant operands (still double-buffered by default).
    weights = 2 * (feat * HIDDEN * 2 + 2 * HIDDEN * LANE * 2 + 3 * LANE * 4)
    b = max(8, (vmem_budget_bytes - weights) // per_row)
    b = (b // 8) * 8
    return int(max(8, min(b, max_b, _round_up(n_rows, 8))))


def prepare_params(params, num_classes):
    """One-time parameter prep (cache the result alongside the params):
    bf16 weight casts, fc3 zero-padded to 128 lanes, biases stacked (3,128) f32,
    w1 rows padded so the contraction dim is a multiple of 128 (channel==1 case)."""
    w1 = jnp.asarray(params["w1"], jnp.float32)
    f_in = w1.shape[0]
    f_pad = _round_up(f_in, 128)
    if f_pad != f_in:
        w1 = jnp.pad(w1, ((0, f_pad - f_in), (0, 0)))

    w3 = jnp.asarray(params["w3"], jnp.float32)
    c = w3.shape[1]
    assert c == num_classes
    w3p = jnp.zeros((HIDDEN, LANE), jnp.float32).at[:, :c].set(w3)

    bias = jnp.zeros((3, LANE), jnp.float32)
    bias = bias.at[0, :HIDDEN].set(params["b1"])
    bias = bias.at[1, :HIDDEN].set(params["b2"])
    bias = bias.at[2, :c].set(params["b3"])

    return {
        "w1": w1.astype(jnp.bfloat16),
        "w2": jnp.asarray(params["w2"], jnp.bfloat16),
        "w3": w3p.astype(jnp.bfloat16),
        "bias": bias,
    }


# ----------------------------------------------------------------------------
# Wrapper
# ----------------------------------------------------------------------------
@functools.partial(jax.jit, static_argnames=("num_classes", "block_b"))
def mlp_forward(x, prepped, num_classes, block_b=None):
    w1, w2, w3, bias = prepped["w1"], prepped["w2"], prepped["w3"], prepped["bias"]
    N = x.shape[0]
    Fp = w1.shape[0]

    # x.view(N, -1); pad feature dim only if w1 was lane-padded (channel==1 path).
    x_flat = x.reshape(N, -1)
    if x_flat.shape[1] != Fp:
        x_flat = jnp.pad(x_flat, ((0, 0), (0, Fp - x_flat.shape[1])))
    x_flat = x_flat.astype(jnp.bfloat16)

    if block_b is None:
        B = _pick_block_b(N, Fp)
    else:
        B = min(block_b, _round_up(N, 8))
    B = max(8, (B // 8) * 8)

    # No batch padding: cdiv grid, Pallas masks the partial last tile's
    # reads/writes and rows are independent, so results are unaffected.
    grid = (pl.cdiv(N, B),)

    out = pl.pallas_call(
        mlp_kernel,
        out_shape=jax.ShapeDtypeStruct((N, LANE), jnp.float32),
        grid=grid,
        in_specs=[
            pl.BlockSpec((B, Fp), lambda i: (i, 0)),
            pl.BlockSpec((Fp, HIDDEN), lambda i: (0, 0)),
            pl.BlockSpec((HIDDEN, HIDDEN), lambda i: (0, 0)),
            pl.BlockSpec((HIDDEN, LANE), lambda i: (0, 0)),
            pl.BlockSpec((3, LANE), lambda i: (0, 0)),
        ],
        out_specs=pl.BlockSpec((B, LANE), lambda i: (i, 0)),
        compiler_params=pltpu.CompilerParams(
            dimension_semantics=("parallel",)),
    )(x_flat, w1, w2, w3, bias)

    # Drop the zero-padded output lanes.
    return out[:, :num_classes]


# ----------------------------------------------------------------------------
# Pure-JAX references for correctness checks
# ----------------------------------------------------------------------------
def ref_forward_f32(x, params):
    h = x.reshape(x.shape[0], -1).astype(jnp.float32)
    h = jnp.maximum(h @ params["w1"] + params["b1"], 0.0)
    h = jnp.maximum(h @ params["w2"] + params["b2"], 0.0)
    return h @ params["w3"] + params["b3"]


def ref_forward_bf16(x, params):
    # Same numerics as the kernel: bf16 MXU operands, f32 accumulation/elementwise.
    def mm(a, w):
        return jnp.dot(a.astype(jnp.bfloat16), w.astype(jnp.bfloat16),
                       preferred_element_type=jnp.float32)
    h = x.reshape(x.shape[0], -1).astype(jnp.float32)
    h = jnp.maximum(mm(h, params["w1"]) + params["b1"], 0.0)
    h = jnp.maximum(mm(h, params["w2"]) + params["b2"], 0.0)
    return mm(h, params["w3"]) + params["b3"]


# ----------------------------------------------------------------------------
def init_params(key, channel, num_classes, res):
    in_feat = 28 * 28 * 1 if channel == 1 else res * res * 3
    k1, k2, k3, k4, k5, k6 = jax.random.split(key, 6)
    s1 = float(1.0 / jnp.sqrt(in_feat))
    s2 = float(1.0 / jnp.sqrt(HIDDEN))
    return {
        "w1": jax.random.uniform(k1, (in_feat, HIDDEN), jnp.float32, -s1, s1),
        "b1": jax.random.uniform(k2, (HIDDEN,), jnp.float32, -s1, s1),
        "w2": jax.random.uniform(k3, (HIDDEN, HIDDEN), jnp.float32, -s2, s2),
        "b2": jax.random.uniform(k4, (HIDDEN,), jnp.float32, -s2, s2),
        "w3": jax.random.uniform(k5, (HIDDEN, num_classes), jnp.float32, -s2, s2),
        "b3": jax.random.uniform(k6, (num_classes,), jnp.float32, -s2, s2),
    }


if __name__ == "__main__":
    channel, num_classes, res = 3, 10, 16   # in_features = 16*16*3 = 768
    batch = 40                              # 40 = 16+16+8 -> exercises a partial tile below

    key = jax.random.PRNGKey(0)
    key, kx = jax.random.split(key)
    x = jax.random.normal(kx, (batch, channel, res, res), jnp.float32)
    params = init_params(key, channel, num_classes, res)
    prepped = prepare_params(params, num_classes)   # one-time prep, cached with params

    # Default VMEM-sized tile (single grid step at this tiny demo size).
    out = jax.block_until_ready(mlp_forward(x, prepped, num_classes))
    # Explicit small tile: multi-step grid + masked partial last tile path.
    out_tiled = jax.block_until_ready(mlp_forward(x, prepped, num_classes, block_b=16))

    ref16 = ref_forward_bf16(x, params)   # kernel-matching numerics (tight check)
    ref32 = ref_forward_f32(x, params)    # PyTorch f32 semantics (loose check)
    for o in (out, out_tiled):
        assert o.shape == (batch, num_classes), o.shape
        assert jnp.allclose(o, ref16, atol=2e-3, rtol=2e-3), (
            float(jnp.max(jnp.abs(o - ref16))))
        assert jnp.allclose(o, ref32, atol=3e-2, rtol=3e-2), (
            float(jnp.max(jnp.abs(o - ref32))))

    print("KERNEL_OK")
</pallas_src>

<mosaic_0001>
module attributes {stable_mosaic.version = 11 : i64} {
  func.func @mlp_kernel(%arg0: i32, %arg1: memref<40x768xbf16, #tpu.memory_space<vmem>>, %arg2: memref<768x128xbf16, #tpu.memory_space<vmem>>, %arg3: memref<128x128xbf16, #tpu.memory_space<vmem>>, %arg4: memref<128x128xbf16, #tpu.memory_space<vmem>>, %arg5: memref<3x128xf32, #tpu.memory_space<vmem>>, %arg6: memref<40x128xf32, #tpu.memory_space<vmem>>) attributes {dimension_semantics = [#tpu.dimension_semantics<parallel>], iteration_bounds = array<i64: 1>, scalar_prefetch = 0 : i64, scratch_operands = 0 : i64, tpu.core_type = #tpu.core_type<tc>, window_params = [{transform_indices = @transform_0, window_bounds = array<i64: 40, 768>}, {pipeline_mode = #tpu.pipeline_mode<synchronous>, transform_indices = @transform_1, window_bounds = array<i64: 768, 128>}, {pipeline_mode = #tpu.pipeline_mode<synchronous>, transform_indices = @transform_2, window_bounds = array<i64: 128, 128>}, {pipeline_mode = #tpu.pipeline_mode<synchronous>, transform_indices = @transform_3, window_bounds = array<i64: 128, 128>}, {pipeline_mode = #tpu.pipeline_mode<synchronous>, transform_indices = @transform_4, window_bounds = array<i64: 3, 128>}, {transform_indices = @transform_5, window_bounds = array<i64: 40, 128>}]} {
    %c0 = arith.constant 0 : index
    %c0_0 = arith.constant 0 : index
    %0 = vector.load %arg5[%c0, %c0_0] : memref<3x128xf32, #tpu.memory_space<vmem>>, vector<3x128xf32>
    %c0_1 = arith.constant 0 : index
    %c0_2 = arith.constant 0 : index
    %1 = vector.load %arg1[%c0_1, %c0_2] : memref<40x768xbf16, #tpu.memory_space<vmem>>, vector<40x768xbf16>
    %c0_3 = arith.constant 0 : index
    %c0_4 = arith.constant 0 : index
    %2 = vector.load %arg2[%c0_3, %c0_4] : memref<768x128xbf16, #tpu.memory_space<vmem>>, vector<768x128xbf16>
    %cst = arith.constant dense<0.000000e+00> : vector<40x128xf32>
    %3 = tpu.matmul %1, %2, %cst {dimension_numbers = #tpu.dot_dimension_numbers<[1], [0], [0], [1], [0, 0, 1, 1], [], []>} : vector<40x768xbf16>, vector<768x128xbf16>, vector<40x128xf32> -> vector<40x128xf32>
    %4 = vector.extract_strided_slice %0 {offsets = [0, 0], sizes = [1, 128], strides = [1, 1]} : vector<3x128xf32> to vector<1x128xf32>
    %5 = vector.broadcast %4 : vector<1x128xf32> to vector<40x128xf32>
    %6 = arith.addf %3, %5 : vector<40x128xf32>
    %cst_5 = arith.constant 0.000000e+00 : f32
    %7 = vector.broadcast %cst_5 : f32 to vector<40x128xf32>
    %8 = arith.maximumf %6, %7 : vector<40x128xf32>
    %9 = arith.truncf %8 : vector<40x128xf32> to vector<40x128xbf16>
    %c0_6 = arith.constant 0 : index
    %c0_7 = arith.constant 0 : index
    %10 = vector.load %arg3[%c0_6, %c0_7] : memref<128x128xbf16, #tpu.memory_space<vmem>>, vector<128x128xbf16>
    %cst_8 = arith.constant dense<0.000000e+00> : vector<40x128xf32>
    %11 = tpu.matmul %9, %10, %cst_8 {dimension_numbers = #tpu.dot_dimension_numbers<[1], [0], [0], [1], [0, 0, 1, 1], [], []>} : vector<40x128xbf16>, vector<128x128xbf16>, vector<40x128xf32> -> vector<40x128xf32>
    %12 = vector.extract_strided_slice %0 {offsets = [1, 0], sizes = [1, 128], strides = [1, 1]} : vector<3x128xf32> to vector<1x128xf32>
    %13 = vector.broadcast %12 : vector<1x128xf32> to vector<40x128xf32>
    %14 = arith.addf %11, %13 : vector<40x128xf32>
    %cst_9 = arith.constant 0.000000e+00 : f32
    %15 = vector.broadcast %cst_9 : f32 to vector<40x128xf32>
    %16 = arith.maximumf %14, %15 : vector<40x128xf32>
    %17 = arith.truncf %16 : vector<40x128xf32> to vector<40x128xbf16>
    %c0_10 = arith.constant 0 : index
    %c0_11 = arith.constant 0 : index
    %18 = vector.load %arg4[%c0_10, %c0_11] : memref<128x128xbf16, #tpu.memory_space<vmem>>, vector<128x128xbf16>
    %cst_12 = arith.constant dense<0.000000e+00> : vector<40x128xf32>
    %19 = tpu.matmul %17, %18, %cst_12 {dimension_numbers = #tpu.dot_dimension_numbers<[1], [0], [0], [1], [0, 0, 1, 1], [], []>} : vector<40x128xbf16>, vector<128x128xbf16>, vector<40x128xf32> -> vector<40x128xf32>
    %20 = vector.extract_strided_slice %0 {offsets = [2, 0], sizes = [1, 128], strides = [1, 1]} : vector<3x128xf32> to vector<1x128xf32>
    %21 = vector.broadcast %20 : vector<1x128xf32> to vector<40x128xf32>
    %22 = arith.addf %19, %21 : vector<40x128xf32>
    %c0_13 = arith.constant 0 : index
    %c0_14 = arith.constant 0 : index
    %23 = vector.load %arg6[%c0_13, %c0_14] : memref<40x128xf32, #tpu.memory_space<vmem>>, vector<40x128xf32>
    tpu.vector_store %arg6[%c0_13, %c0_14], %22 {strides = array<i32>} : memref<40x128xf32, #tpu.memory_space<vmem>>, vector<40x128xf32>,
    return
  }
  func.func @transform_0(%arg0: i32) -> (i32, i32) {
    %c0_i32 = arith.constant 0 : i32
    %c0_i32_0 = arith.constant 0 : i32
    return %arg0, %c0_i32 : i32, i32
  }
  func.func @transform_1(%arg0: i32) -> (i32, i32) {
    %c0_i32 = arith.constant 0 : i32
    %c0_i32_0 = arith.constant 0 : i32
    %c0_i32_1 = arith.constant 0 : i32
    return %c0_i32, %c0_i32_0 : i32, i32
  }
  func.func @transform_2(%arg0: i32) -> (i32, i32) {
    %c0_i32 = arith.constant 0 : i32
    %c0_i32_0 = arith.constant 0 : i32
    %c0_i32_1 = arith.constant 0 : i32
    return %c0_i32, %c0_i32_0 : i32, i32
  }
  func.func @transform_3(%arg0: i32) -> (i32, i32) {
    %c0_i32 = arith.constant 0 : i32
    %c0_i32_0 = arith.constant 0 : i32
    %c0_i32_1 = arith.constant 0 : i32
    return %c0_i32, %c0_i32_0 : i32, i32
  }
  func.func @transform_4(%arg0: i32) -> (i32, i32) {
    %c0_i32 = arith.constant 0 : i32
    %c0_i32_0 = arith.constant 0 : i32
    %c0_i32_1 = arith.constant 0 : i32
    return %c0_i32, %c0_i32_0 : i32, i32
  }
  func.func @transform_5(%arg0: i32) -> (i32, i32) {
    %c0_i32 = arith.constant 0 : i32
    %c0_i32_0 = arith.constant 0 : i32
    return %arg0, %c0_i32 : i32, i32
  }
}

</mosaic_0001>

<bundles_post_ra>
// kernel: mlp_forward.1
= control target key start
LH: loop header
LB: loop body
LE: loop exit
PB: predicated region body
PF: predicated region fallthrough
CT: control target
= control target key end

     0   :  { %vm1316_vm0 = vmmov 0   ;;  %s1672_s1 = inlined_call_operand.vmem [shape: bf16[768,128], index: 1, kind: input, shape index: {}]   ;;  %s1673_s0 = inlined_call_operand.vmem [shape: bf16[40,768], index: 0, kind: input, shape index: {}]   ;;  %s1674_s2 = inlined_call_operand.vmem [shape: bf16[128,128], index: 2, kind: input, shape index: {}]   ;;  %s1675_s3 = inlined_call_operand.vmem [shape: bf16[128,128], index: 3, kind: input, shape index: {}]   ;;  %s1676_s4 = inlined_call_operand.vmem [shape: f32[3,128], index: 4, kind: input, shape index: {}]   ;;  %s1677_s5 = inlined_call_operand.vmem [shape: f32[40,128], index: 5, kind: output, shape index: {}]  }
   0x1   :  { %v1227_v0 = vld [vmem:[%s1672_s1 + $0x40] sm:$0xff]   ;;  %v1231_v4 = vld [vmem:[%s1672_s1 + $0x48] sm:$0xff]   ;;  %v1235_v8 = vld [vmem:[%s1672_s1 + $0x50] sm:$0xff]  }
   0x2   :  { %v1228_v1 = vld [vmem:[%s1672_s1] sm:$0xff]   ;;  %1029 = vmatprep.subr.bf16.mxu0 %v1227_v0  ;;  %v1232_v5 = vld [vmem:[%s1672_s1 + $0x8] sm:$0xff]   ;;  %v1236_v9 = vld [vmem:[%s1672_s1 + $0x10] sm:$0xff]  }
   0x3   :  { %v1229_v2 = vld [vmem:[%s1672_s1 + $0xc0] sm:$0xff]   ;;  %1030 = vmatpush3.bf16.msra.mxu0 %v1228_v1  ;;  %v1233_v6 = vld [vmem:[%s1672_s1 + $0xc8] sm:$0xff]   ;;  %v1237_v10 = vld [vmem:[%s1672_s1 + $0xd0] sm:$0xff]  }
   0x4   :  { %v1230_v3 = vld [vmem:[%s1672_s1 + $0x80] sm:$0xff]   ;;  %1063 = vmatprep.subr.bf16.mxu1 %v1229_v2  ;;  %1031 = vmatprep.subr.bf16.mxu0 %v1231_v4  ;;  %v1234_v7 = vld [vmem:[%s1672_s1 + $0x88] sm:$0xff]   ;;  %v1238_v11 = vld [vmem:[%s1672_s1 + $0x90] sm:$0xff]  }
   0x5   :  { %1064 = vmatpush3.bf16.msra.mxu1 %v1230_v3  ;;  %v1239_v12 = vld [vmem:[%s1672_s1 + $0x58] sm:$0xff]   ;;  %v1243_v16 = vld [vmem:[%s1672_s1 + $0x60] sm:$0xff]   ;;  %v1247_v20 = vld [vmem:[%s1672_s1 + $0x68] sm:$0xff]  }
   0x6   :  { %1065 = vmatprep.subr.bf16.mxu1 %v1233_v6  ;;  %v1240_v13 = vld [vmem:[%s1672_s1 + $0x18] sm:$0xff]   ;;  %v1244_v17 = vld [vmem:[%s1672_s1 + $0x20] sm:$0xff]   ;;  %v1248_v21 = vld [vmem:[%s1672_s1 + $0x28] sm:$0xff]  }
   0x7   :  { %1032 = vmatpush3.bf16.msra.mxu0 %v1232_v5  ;;  %v1241_v14 = vld [vmem:[%s1672_s1 + $0xd8] sm:$0xff]   ;;  %v1245_v18 = vld [vmem:[%s1672_s1 + $0xe0] sm:$0xff]   ;;  %v1249_v22 = vld [vmem:[%s1672_s1 + $0xe8] sm:$0xff]   ;;  %v1315_v5 = vmov 0.0  }
   0x8   :  { %1033 = vmatprep.subr.bf16.mxu0 %v1235_v8  ;;  %v1242_v15 = vld [vmem:[%s1672_s1 + $0x98] sm:$0xff]   ;;  %v1246_v19 = vld [vmem:[%s1672_s1 + $0xa0] sm:$0xff]   ;;  %v1250_v23 = vld [vmem:[%s1672_s1 + $0xa8] sm:$0xff]  }
   0x9   :  { %1066 = vmatpush3.bf16.msra.mxu1 %v1234_v7  ;;  %v1251_v24 = vld [vmem:[%s1672_s1 + $0x70] sm:$0xff]   ;;  %v1255_v28 = vld [vmem:[%s1672_s1 + $0x78] sm:$0xff]   ;;  %v1262_v34 = vld [vmem:[%s1672_s1 + $0x140] sm:$0xff]  }
   0xa   :  { %1067 = vmatprep.subr.bf16.mxu1 %v1237_v10  ;;  %v1252_v25 = vld [vmem:[%s1672_s1 + $0x30] sm:$0xff]   ;;  %v1256_v29 = vld [vmem:[%s1672_s1 + $0x38] sm:$0xff]   ;;  %v1263_v35 = vld [vmem:[%s1673_s0 + $0x8] ss:$24 sps:$4 sm:$0xff]  }
   0xb   :  { %1034 = vmatpush3.bf16.msra.mxu0 %v1236_v9  ;;  %v1253_v26 = vld [vmem:[%s1672_s1 + $0xf0] sm:$0xff]   ;;  %v1257_v30 = vld [vmem:[%s1672_s1 + $0xf8] sm:$0xff]   ;;  %v1265_v36 = vld [vmem:[%s1673_s0 + $0xc] ss:$24 sps:$4 sm:$0xff]  }
   0xc   :  { %1035 = vmatprep.subr.bf16.mxu0 %v1239_v12  ;;  %v1254_v27 = vld [vmem:[%s1672_s1 + $0xb0] sm:$0xff]   ;;  %v1258_v31 = vld [vmem:[%s1673_s0] ss:$24 sps:$4 sm:$0xff]   ;;  %v1260_v32 = vld [vmem:[%s1673_s0 + $0x4] ss:$24 sps:$4 sm:$0xff]   ;;  %594 = vmatprep.mubr.bf16.mxu1 %v1265_v36 }
   0xd   :  { %1068 = vmatpush3.bf16.msra.mxu1 %v1238_v11  ;;  %v1261_v33 = vld [vmem:[%s1672_s1 + $0xb8] sm:$0xff]   ;;  %538 = vmatprep.mubr.bf16.mxu0 %v1260_v32  ;;  %v1266_v37 = vld [vmem:[%s1672_s1 + $0x100] sm:$0xff]   ;;  %v1267_v38 = vld [vmem:[%s1672_s1 + $0x148] sm:$0xff]  }
   0xe   :  { %1069 = vmatprep.subr.bf16.mxu1 %v1241_v14  ;;  %v1268_v39 = vld [vmem:[%s1672_s1 + $0x108] sm:$0xff]   ;;  %v1269_v40 = vld [vmem:[%s1672_s1 + $0x150] sm:$0xff]   ;;  %v1273_v44 = vld [vmem:[%s1672_s1 + $0x158] sm:$0xff]  }
   0xf   :  { %1036 = vmatpush3.bf16.msra.mxu0 %v1240_v13  ;;  %v1271_v41 = vld [vmem:[%s1673_s0 + $0x34] ss:$24 sps:$4 sm:$0xff]   ;;  %v1274_v43 = vld [vmem:[%s1673_s0 + $0x30] ss:$24 sps:$4 sm:$0xff]   ;;  %v1275_v47 = vld [vmem:[%s1672_s1 + $0x118] sm:$0xff]  }
  0x10   :  { %1037 = vmatprep.subr.bf16.mxu0 %v1243_v16  ;;  %v1270_v42 = vld [vmem:[%s1672_s1 + $0x110] sm:$0xff]   ;;  %v1279_v48 = vld [vmem:[%s1672_s1 + $0x160] sm:$0xff]   ;;  %v35_v52 = vld [vmem:[%s1673_s0 + $0x68] sm:$0xff] }
  0x11   :  { %1070 = vmatpush3.bf16.msra.mxu1 %v1242_v15  ;;  %v1276_v45 = vld [vmem:[%s1673_s0 + $0x3c] ss:$24 sps:$4 sm:$0xff]   ;;  %v1278_v46 = vld [vmem:[%s1673_s0 + $0x38] ss:$24 sps:$4 sm:$0xff]   ;;  %v34_v49 = vld [vmem:[%s1673_s0 + $0x60] sm:$0xff]  ;;  %v962_v54 = vcombine.high %v35_v52, %v35_v52  ;;  %v961_v56 = vcombine.low %v35_v52, %v35_v52 }
  0x12   :  { %1071 = vmatprep.subr.bf16.mxu1 %v1245_v18  ;;  %v960_v50 = vcombine.high %v34_v49, %v34_v49  ;;  %v959_v51 = vcombine.low %v34_v49, %v34_v49  ;;  %v1280_v53 = vld [vmem:[%s1672_s1 + $0x120] sm:$0xff]   ;;  %v1282_v55 = vld [vmem:[%s1672_s1 + $0x168] sm:$0xff]   ;;  %v1286_v58 = vld [vmem:[%s1672_s1 + $0x170] sm:$0xff]  }
  0x13   :  { %1038 = vmatpush3.bf16.msra.mxu0 %v1244_v17  ;;  %v1284_v57 = vld [vmem:[%s1672_s1 + $0x128] sm:$0xff]   ;;  %v1288_v60 = vld [vmem:[%s1672_s1 + $0x130] sm:$0xff]   ;;  %v1289_v61 = vld [vmem:[%s1672_s1 + $0x178] sm:$0xff]  }
  0x14   :  { %1039 = vmatprep.subr.bf16.mxu0 %v1247_v20  ;;  %v1293_v59 = vld [vmem:[%s1673_s0 + $0x14] ss:$24 sps:$4 sm:$0xff]   ;;  %v1290_v62 = vld [vmem:[%s1672_s1 + $0x138] sm:$0xff]   ;;  %v1291_v63 = vld [vmem:[%s1673_s0 + $0x10] ss:$24 sps:$4 sm:$0xff]   ;;  %v133_v20 = vlaneseq }
  0x15   :  { %1072 = vmatpush3.bf16.msra.mxu1 %v1246_v19  ;;  %v1294_v0 = vld [vmem:[%s1673_s0 + $0x44] ss:$24 sps:$4 sm:$0xff]   ;;  %v36_v1 = vld [vmem:[%s1673_s0 + $0x70] sm:$0xff]  ;;  %v1296_v2 = vld [vmem:[%s1673_s0 + $0x40] ss:$24 sps:$4 sm:$0xff]  }
  0x16   :  { %1073 = vmatprep.subr.bf16.mxu1 %v1249_v22  ;;  %v964_v3 = vcombine.high %v36_v1, %v36_v1  ;;  %v963_v4 = vcombine.low %v36_v1, %v36_v1  ;;  %v1299_v6 = vld [vmem:[%s1674_s2] sm:$0xff]   ;;  %v1300_v7 = vld [vmem:[%s1674_s2 + $0x8] sm:$0xff]   ;;  %v1301_v8 = vld [vmem:[%s1674_s2 + $0x10] sm:$0xff]  }
  0x17   :  { %1040 = vmatpush3.bf16.msra.mxu0 %v1248_v21  ;;  %v1302_v9 = vld [vmem:[%s1674_s2 + $0x18] sm:$0xff]   ;;  %v1303_v10 = vld [vmem:[%s1674_s2 + $0x20] sm:$0xff]   ;;  %v1304_v11 = vld [vmem:[%s1674_s2 + $0x28] sm:$0xff]   ;;  %v1616_v21 = vshrl.u32 %v133_v20, 7 }
  0x18   :  { %1041 = vmatprep.subr.bf16.mxu0 %v1251_v24  ;;  %v1305_v12 = vld [vmem:[%s1674_s2 + $0x30] sm:$0xff]   ;;  %v1306_v13 = vld [vmem:[%s1674_s2 + $0x38] sm:$0xff]   ;;  %v1577_v14 = vld [vmem:[%s1675_s3] sm:$0xff]  }
  0x19   :  { %1074 = vmatpush3.bf16.msra.mxu1 %v1250_v23  ;;  %v1583_v15 = vld [vmem:[%s1675_s3 + $0x8] sm:$0xff]   ;;  %v1589_v16 = vld [vmem:[%s1675_s3 + $0x10] sm:$0xff]   ;;  %v1597_v17 = vld [vmem:[%s1675_s3 + $0x18] sm:$0xff]   ;;  %v135_v22 = vsub.s32 0, %v1616_v21 }
  0x1a   :  { %1075 = vmatprep.subr.bf16.mxu1 %v1253_v26  ;;  %v1604_v18 = vld [vmem:[%s1675_s3 + $0x20] sm:$0xff]   ;;  %v1611_v19 = vld [vmem:[%s1675_s3 + $0x28] sm:$0xff]  }
  0x1b   :  { %1042 = vmatpush3.bf16.msra.mxu0 %v1252_v25  ;;  %v1622_v23 = vld [vmem:[%s1676_s4] sm:$0x7] }
  0x1c   :  { %1043 = vmatprep.subr.bf16.mxu0 %v1255_v28  ;;  %v136_v25 = vrot.slane %v1622_v23, %v135_v22 }
  0x1d   :  { %1076 = vmatpush3.bf16.msra.mxu1 %v1254_v27 }
  0x1e   :  { %1077 = vmatprep.subr.bf16.mxu1 %v1257_v30 }
  0x1f   :  { %1044 = vmatpush3.bf16.msra.mxu0 %v1256_v29 }
  0x20   :  { %1097 = vmatprep.subr.bf16.mxu0 %v1262_v34 }
  0x21   :  { %1078 = vmatpush3.bf16.msra.mxu1 %v1261_v33 }
  0x22   :  { %539 = vmatmul.mubr.bf16.vlgmr.msra.gmra.mrb[0].mxu0 %v1258_v31  ;;  %1153 = vmatprep.subr.bf16.mxu1 %v1315_v5 }
  0x23   :  { %1098 = vmatpush3.bf16.msra.mxu0 %v1266_v37  ;;  %546 = vmatprep.mubr.bf16.mxu0 %v1271_v41 }
  0x24   :  { %595 = vmatmul.mubr.bf16.vlgmr.msra.gmra.mrb[0].mxu1 %v1263_v35  ;;  %1099 = vmatprep.subr.bf16.mxu0 %v1267_v38 }
  0x25   :  { %602 = vmatprep.mubr.bf16.mxu1 %v1276_v45  ;;  %1154 = vmatpush3.bf16.msra.mxu1 %v1299_v6 }
  0x26   :  { %1155 = vmatprep.subr.bf16.mxu1 %v1315_v5 }
  0x27   :  { %1100 = vmatpush3.bf16.msra.mxu0 %v1268_v39 }
  0x28   :  { %1101 = vmatprep.subr.bf16.mxu0 %v1269_v40 }
  0x29   :  { %1156 = vmatpush3.bf16.msra.mxu1 %v1300_v7 }
  0x2a   :  { %547 = vmatmul.mubr.bf16.gmra.mrb[4].mxu0 %v1274_v43  ;;  %1157 = vmatprep.subr.bf16.mxu1 %v1315_v5 }
  0x2b   :  { %1102 = vmatpush3.bf16.msra.mxu0 %v1270_v42  ;;  %554 = vmatprep.mubr.bf16.mxu0 %v960_v50 }
  0x2c   :  { %1103 = vmatprep.subr.bf16.mxu0 %v1273_v44  ;;  %603 = vmatmul.mubr.bf16.gmra.mrb[4].mxu1 %v1278_v46 }
  0x2d   :  { %610 = vmatprep.mubr.bf16.mxu1 %v962_v54  ;;  %1158 = vmatpush3.bf16.msra.mxu1 %v1301_v8 }
  0x2e   :  { %1159 = vmatprep.subr.bf16.mxu1 %v1315_v5 }
  0x2f   :  { %1104 = vmatpush3.bf16.msra.mxu0 %v1275_v47 }
  0x30   :  { %1105 = vmatprep.subr.bf16.mxu0 %v1279_v48 }
  0x31   :  { %1160 = vmatpush3.bf16.msra.mxu1 %v1302_v9 }
  0x32   :  { %555 = vmatmul.mubr.bf16.gmra.mrb[8].mxu0 %v959_v51  ;;  %1161 = vmatprep.subr.bf16.mxu1 %v1315_v5 }
  0x33   :  { %1106 = vmatpush3.bf16.msra.mxu0 %v1280_v53  ;;  %650 = vmatprep.mubr.bf16.mxu0 %v1293_v59 }
  0x34   :  { %1107 = vmatprep.subr.bf16.mxu0 %v1282_v55  ;;  %611 = vmatmul.mubr.bf16.gmra.mrb[8].mxu1 %v961_v56 }
  0x35   :  { %1162 = vmatpush3.bf16.msra.mxu1 %v1303_v10  ;;  %1169 = vmatprep.mubr.msk.bf16.mxu1 %vm1316_vm0, %v1315_v5 }
  0x36   :  { %1163 = vmatprep.subr.bf16.mxu1 %v1315_v5 }
  0x37   :  { %1108 = vmatpush3.bf16.msra.mxu0 %v1284_v57 }
  0x38   :  { %1109 = vmatprep.subr.bf16.mxu0 %v1286_v58 }
  0x39   :  { %1164 = vmatpush3.bf16.msra.mxu1 %v1304_v11 }
  0x3a   :  { %1165 = vmatprep.subr.bf16.mxu1 %v1315_v5 }
  0x3b   :  { %1110 = vmatpush3.bf16.msra.mxu0 %v1288_v60 }
  0x3c   :  { %1111 = vmatprep.subr.bf16.mxu0 %v1289_v61 }
  0x3d   :  { %1166 = vmatpush3.bf16.msra.mxu1 %v1305_v12 }
  0x3e   :  { %1167 = vmatprep.subr.bf16.mxu1 %v1315_v5 }
  0x3f   :  { %1112 = vmatpush3.bf16.msra.mxu0 %v1290_v62 }
  0x40   :  { %1181 = vmatprep.subr.bf16.mxu0 %v1315_v5 }
  0x41   :  { %1168 = vmatpush3.bf16.msra.mxu1 %v1306_v13 }
  0x42   :  { %651 = vmatmul.mubr.bf16.vlgmr.msra.gmra.mrb[12].mxu0 %v1291_v63  ;;  %1209 = vmatprep.subr.bf16.mxu1 %v1315_v5 }
  0x43   :  { %658 = vmatprep.mubr.bf16.mxu0 %v1294_v0  ;;  %1182 = vmatpush3.bf16.msra.mxu0 %v1577_v14 }
  0x44   :  { %1183 = vmatprep.subr.bf16.mxu0 %v1315_v5 }
  0x47   :  { %1184 = vmatpush3.bf16.msra.mxu0 %v1583_v15 }
  0x48   :  { %1185 = vmatprep.subr.bf16.mxu0 %v1315_v5 }
  0x4a   :  { %659 = vmatmul.mubr.bf16.gmra.mrb[16].mxu0 %v1296_v2 }
  0x4b   :  { %666 = vmatprep.mubr.bf16.mxu0 %v964_v3  ;;  %1186 = vmatpush3.bf16.msra.mxu0 %v1589_v16 }
  0x4c   :  { %1187 = vmatprep.subr.bf16.mxu0 %v1315_v5 }
  0x4f   :  { %1188 = vmatpush3.bf16.msra.mxu0 %v1597_v17 }
  0x50   :  { %1189 = vmatprep.subr.bf16.mxu0 %v1315_v5 }
  0x52   :  { %667 = vmatmul.mubr.bf16.gmra.mrb[20].mxu0 %v963_v4 }
  0x53   :  { %1197 = vmatprep.mubr.msk.bf16.mxu0 %vm1316_vm0, %v1315_v5  ;;  %1190 = vmatpush3.bf16.msra.mxu0 %v1604_v18 }
  0x54   :  { %1191 = vmatprep.subr.bf16.mxu0 %v1315_v5 }
  0x57   :  { %1192 = vmatpush3.bf16.msra.mxu0 %v1611_v19 }
  0x58   :  { %1193 = vmatprep.subr.bf16.mxu0 %v1315_v5 }
  0xf5   :  { %v1045_v24 = vpop.f32.mrb[0].mxu0 }
  0xf6   :  { %v1046_v26 = vpop.f32.mrb[1].mxu0 }
  0xf7   :  { %v1047_v27 = vadd.f32 %v1046_v26, %v1045_v24  ;;  %v1048_v28 = vpop.f32.mrb[2].mxu0  ;;  %v1079_v29 = vpop.f32.mrb[0].mxu1 }
  0xf8   :  { %v1049_v30 = vpop.f32.mrb[3].mxu0  ;;  %v1080_v33 = vpop.f32.mrb[1].mxu1 }
  0xf9   :  { %v541_v31 = vadd.f32 %v1047_v27, %v136_v25  ;;  %v1050_v32 = vadd.f32 %v1049_v30, %v1048_v28  ;;  %v1081_v34 = vadd.f32 %v1080_v33, %v1079_v29  ;;  %v1082_v35 = vpop.f32.mrb[2].mxu1 }
  0xfa   :  { %v1083_v37 = vpop.f32.mrb[3].mxu1 }
  0xfb   :  { %v544_v36 = vadd.f32 %v1050_v32, %v136_v25  ;;  %v597_v38 = vadd.f32 %v1081_v34, %v541_v31  ;;  %v1084_v39 = vadd.f32 %v1083_v37, %v1082_v35 }
  0xfd   :  { %v600_v40 = vadd.f32 %v1084_v39, %v544_v36  ;;  %v1051_v41 = vpop.f32.mrb[4].mxu0 }
  0xfe   :  { %v1052_v42 = vpop.f32.mrb[5].mxu0 }
  0xff   :  { %v1053_v43 = vadd.f32 %v1052_v42, %v1051_v41  ;;  %v1054_v44 = vpop.f32.mrb[6].mxu0  ;;  %v1085_v45 = vpop.f32.mrb[4].mxu1 }
 0x100   :  { %v1055_v46 = vpop.f32.mrb[7].mxu0  ;;  %v1086_v49 = vpop.f32.mrb[5].mxu1 }
 0x101   :  { %v549_v47 = vadd.f32 %v1053_v43, %v136_v25  ;;  %v1056_v48 = vadd.f32 %v1055_v46, %v1054_v44  ;;  %v1087_v50 = vadd.f32 %v1086_v49, %v1085_v45  ;;  %v1088_v51 = vpop.f32.mrb[6].mxu1 }
 0x102   :  { %v1089_v53 = vpop.f32.mrb[7].mxu1 }
 0x103   :  { %v552_v52 = vadd.f32 %v1056_v48, %v136_v25  ;;  %v605_v54 = vadd.f32 %v1087_v50, %v549_v47  ;;  %v1090_v55 = vadd.f32 %v1089_v53, %v1088_v51 }
 0x105   :  { %v1057_v56 = vpop.f32.mrb[8].mxu0  ;;  %v608_v57 = vadd.f32 %v1090_v55, %v552_v52 }
 0x106   :  { %v1058_v58 = vpop.f32.mrb[9].mxu0 }
 0x107   :  { %v1059_v59 = vadd.f32 %v1058_v58, %v1057_v56  ;;  %v1060_v60 = vpop.f32.mrb[10].mxu0  ;;  %v1091_v62 = vpop.f32.mrb[8].mxu1 }
 0x108   :  { %v1061_v61 = vpop.f32.mrb[11].mxu0  ;;  %v1092_v0 = vpop.f32.mrb[9].mxu1 }
 0x109   :  { %v557_v63 = vadd.f32 %v1059_v59, %v136_v25  ;;  %v1093_v1 = vadd.f32 %v1092_v0, %v1091_v62  ;;  %v1094_v2 = vpop.f32.mrb[10].mxu1 }
 0x10a   :  { %v1095_v3 = vpop.f32.mrb[11].mxu1 }
 0x10b   :  { %v613_v4 = vadd.f32 %v1093_v1, %v557_v63  ;;  %v832_v3 = vsub.s32 2, %v1616_v21 }
 0x115   :  { %v1113_v6 = vpop.f32.mrb[12].mxu0 }
 0x116   :  { %v1114_v7 = vpop.f32.mrb[13].mxu0 }
 0x117   :  { %v1115_v8 = vadd.f32 %v1114_v7, %v1113_v6  ;;  %v1116_v9 = vpop.f32.mrb[14].mxu0 }
 0x118   :  { %v1117_v10 = vpop.f32.mrb[15].mxu0 }
 0x119   :  { %v653_v11 = vadd.f32 %v1115_v8, %v597_v38  ;;  %v1118_v12 = vadd.f32 %v1117_v10, %v1116_v9 }
 0x11b   :  { %v656_v13 = vadd.f32 %v1118_v12, %v600_v40  ;;  %v674_v20 = vmax.f32 %v653_v11, 0.0 }
 0x11d   :  { %v675_v22 = vmax.f32 %v656_v13, 0.0  ;;  %v1119_v24 = vpop.f32.mrb[16].mxu0 }
 0x11e   :  { %v1120_v26 = vpop.f32.mrb[17].mxu0 }
 0x11f   :  { %v679_v27 = vpack.c.bf16 %v675_v22, %v674_v20  ;;  %v1121_v28 = vadd.f32 %v1120_v26, %v1119_v24  ;;  %v1122_v25 = vpop.f32.mrb[18].mxu0 }
 0x120   :  { %v1123_v29 = vpop.f32.mrb[19].mxu0 }
 0x121   :  { %v661_v30 = vadd.f32 %v1121_v28, %v605_v54  ;;  %v1124_v31 = vadd.f32 %v1123_v29, %v1122_v25  ;;  %1170 = vmatmul.mubr.bf16.vlgmr.msra.gmra.mrb[12].mxu1 %v679_v27 }
 0x122   :  { %1173 = vmatprep.mubr.msk.bf16.mxu1 %vm1316_vm0, %v1315_v5  ;;  %1217 = vmatpush3.bf16.msra.mxu1 %v1577_v14 }
 0x123   :  { %v664_v32 = vadd.f32 %v1124_v31, %v608_v57  ;;  %1210 = vmatprep.subr.bf16.mxu1 %v1315_v5  ;;  %v676_v33 = vmax.f32 %v661_v30, 0.0 }
 0x125   :  { %v677_v34 = vmax.f32 %v664_v32, 0.0  ;;  %v1125_v35 = vpop.f32.mrb[20].mxu0 }
 0x126   :  { %v1126_v36 = vpop.f32.mrb[21].mxu0  ;;  %1218 = vmatpush3.bf16.msra.mxu1 %v1583_v15  ;;  %v1313_v15 = vld [vmem:[%s1675_s3 + $0x30] sm:$0xff]  }
 0x127   :  { %v1127_v37 = vadd.f32 %v1126_v36, %v1125_v35  ;;  %v1128_v38 = vpop.f32.mrb[22].mxu0  ;;  %v680_v39 = vpack.c.bf16 %v677_v34, %v676_v33  ;;  %1211 = vmatprep.subr.bf16.mxu1 %v1315_v5  ;;  %1194 = vmatpush3.bf16.msra.mxu0 %v1313_v15 }
 0x128   :  { %v1129_v40 = vpop.f32.mrb[23].mxu0  ;;  %1195 = vmatprep.subr.bf16.mxu0 %v1315_v5 }
 0x129   :  { %v669_v41 = vadd.f32 %v1127_v37, %v613_v4  ;;  %1174 = vmatmul.mubr.bf16.gmra.mrb[16].mxu1 %v680_v39  ;;  %v833_v4 = vrot.slane %v1622_v23, %v832_v3 }
 0x12a   :  { %1177 = vmatprep.mubr.msk.bf16.mxu1 %vm1316_vm0, %v1315_v5  ;;  %1219 = vmatpush3.bf16.msra.mxu1 %v1589_v16  ;;  %v1314_v16 = vld [vmem:[%s1675_s3 + $0x38] sm:$0xff]  }
 0x12b   :  { %v678_v14 = vmax.f32 %v669_v41, 0.0  ;;  %1212 = vmatprep.subr.bf16.mxu1 %v1315_v5  ;;  %1196 = vmatpush3.bf16.msra.mxu0 %v1314_v16 }
 0x12d   :  { %v681_v42 = vpack.c.bf16 %v678_v14, %v678_v14 }
 0x12e   :  { %1220 = vmatpush3.bf16.msra.mxu1 %v1597_v17  ;;  %v700_v17 = vsub.s32 1, %v1616_v21 }
 0x12f   :  { %1213 = vmatprep.subr.bf16.mxu1 %v1315_v5 }
 0x131   :  { %1178 = vmatmul.mubr.bf16.gmra.mrb[20].mxu1 %v681_v42 }
 0x132   :  { %1221 = vmatpush3.bf16.msra.mxu1 %v1604_v18  ;;  %1201 = vmatprep.mubr.msk.bf16.mxu1 %vm1316_vm0, %v1315_v5  ;;  %v701_v18 = vrot.slane %v1622_v23, %v700_v17 }
 0x133   :  { %1214 = vmatprep.subr.bf16.mxu1 %v1315_v5 }
 0x136   :  { %1222 = vmatpush3.bf16.msra.mxu1 %v1611_v19 }
 0x137   :  { %1215 = vmatprep.subr.bf16.mxu1 %v1315_v5 }
 0x13a   :  { %1223 = vmatpush3.bf16.msra.mxu1 %v1313_v15 }
 0x13b   :  { %1216 = vmatprep.subr.bf16.mxu1 %v1315_v5 }
 0x13e   :  { %1224 = vmatpush3.bf16.msra.mxu1 %v1314_v16 }
 0x1f4   :  { %v784_v19 = vpop.f32.mrb[12].mxu1 }
 0x1f5   :  { %v785_v43 = vadd.f32 %v784_v19, %v701_v18  ;;  %v1171_v44 = vpop.f32.mrb[13].mxu1 }
 0x1f6   :  { %v787_v45 = vpop.f32.mrb[14].mxu1 }
 0x1f7   :  { %v788_v46 = vadd.f32 %v787_v45, %v701_v18  ;;  %v1172_v47 = vpop.f32.mrb[15].mxu1  ;;  %v806_v48 = vmax.f32 %v785_v43, 0.0 }
 0x1f9   :  { %v807_v49 = vmax.f32 %v788_v46, 0.0 }
 0x1fb   :  { %v811_v50 = vpack.c.bf16 %v807_v49, %v806_v48 }
 0x1fc   :  { %v792_v51 = vpop.f32.mrb[16].mxu1 }
 0x1fd   :  { %v793_v52 = vadd.f32 %v792_v51, %v701_v18  ;;  %v1175_v53 = vpop.f32.mrb[17].mxu1  ;;  %1198 = vmatmul.mubr.bf16.vlgmr.msra.gmra.mrb[24].mxu0 %v811_v50 }
 0x1fe   :  { %v795_v54 = vpop.f32.mrb[18].mxu1 }
 0x1ff   :  { %v796_v55 = vadd.f32 %v795_v54, %v701_v18  ;;  %v1176_v56 = vpop.f32.mrb[19].mxu1  ;;  %v808_v57 = vmax.f32 %v793_v52, 0.0 }
 0x201   :  { %v809_v58 = vmax.f32 %v796_v55, 0.0 }
 0x203   :  { %v812_v59 = vpack.c.bf16 %v809_v58, %v808_v57 }
 0x204   :  { %v800_v60 = vpop.f32.mrb[20].mxu1 }
 0x205   :  { %v801_v61 = vadd.f32 %v800_v60, %v701_v18  ;;  %v1179_v62 = vpop.f32.mrb[21].mxu1  ;;  %1202 = vmatmul.mubr.bf16.vlgmr.msra.gmra.mrb[24].mxu1 %v812_v59 }
 0x206   :  { %v803_v63 = vpop.f32.mrb[22].mxu1  ;;  %1205 = vmatprep.mubr.msk.bf16.mxu1 %vm1316_vm0, %v1315_v5 }
 0x207   :  { %v810_v0 = vmax.f32 %v801_v61, 0.0  ;;  %v1180_v1 = vpop.f32.mrb[23].mxu1 }
 0x209   :  { %v813_v2 = vpack.c.bf16 %v810_v0, %v810_v0 }
 0x20d   :  { %1206 = vmatmul.mubr.bf16.gmra.mrb[28].mxu1 %v813_v2 }
 0x2d0   :  { %v916_v6 = vpop.f32.mrb[24].mxu0 }
 0x2d1   :  { %v917_v7 = vadd.f32 %v916_v6, %v833_v4  ;;  %v1199_v8 = vpop.f32.mrb[25].mxu0 }
 0x2d2   :  { %v919_v9 = vpop.f32.mrb[26].mxu0 }
 0x2d3   :  { %938 = vst [vmem:[%s1677_s5] sm:$0xff] %v917_v7  ;;  %v920_v10 = vadd.f32 %v919_v9, %v833_v4  ;;  %v1200_v11 = vpop.f32.mrb[27].mxu0 }
 0x2d5   :  { %939 = vst [vmem:[%s1677_s5 + $0x8] sm:$0xff] %v920_v10 }
 0x2d8   :  { %v924_v5 = vpop.f32.mrb[24].mxu1 }
 0x2d9   :  { %v925_v12 = vadd.f32 %v924_v5, %v833_v4  ;;  %v1203_v13 = vpop.f32.mrb[25].mxu1 }
 0x2da   :  { %v927_v21 = vpop.f32.mrb[26].mxu1 }
 0x2db   :  { %940 = vst [vmem:[%s1677_s5 + $0x10] sm:$0xff] %v925_v12  ;;  %v928_v23 = vadd.f32 %v927_v21, %v833_v4  ;;  %v1204_v20 = vpop.f32.mrb[27].mxu1 }
 0x2dd   :  { %941 = vst [vmem:[%s1677_s5 + $0x18] sm:$0xff] %v928_v23 }
 0x2e0   :  { %v932_v22 = vpop.f32.mrb[28].mxu1 }
 0x2e1   :  { %v933_v24 = vadd.f32 %v932_v22, %v833_v4  ;;  %v1207_v26 = vpop.f32.mrb[29].mxu1 }
 0x2e2   :  { %v935_v27 = vpop.f32.mrb[30].mxu1 }
 0x2e3   :  { %942 = vst [vmem:[%s1677_s5 + $0x20] sm:$0xff] %v933_v24  ;;  %v1208_v28 = vpop.f32.mrb[31].mxu1 }

</bundles_post_ra>
